<compile_context>
chip_gen: v5e
topology: v5e:2x2
jax: 0.10.0
libtpu: 0.0.40
codegen_flags: <defaults>
</compile_context>

<pallas_src>
import functools

import jax
import jax.numpy as jnp
from jax.experimental import pallas as pl
from jax.experimental.pallas import tpu as pltpu


_LANE = 128
_SUBLANE = 8


def _round_up(x, n):
    return ((x + n - 1) // n) * n


def _mlp_kernel(n_layers, eps, b_real, mxu_dtype, *refs):
    """refs = (x_ref, W1, aff1, W2, aff2, ..., Wn, affn, out_ref).

    W_i  : (in_pad, out_pad) in mxu_dtype (pre-transposed, zero-padded).
    aff_i: (3, out_pad) f32 rows = [bias, gamma, beta] for hidden layers,
           (1, out_pad) f32 row  = [bias] for the last layer.
    """
    x_ref = refs[0]
    out_ref = refs[-1]
    p = refs[1:-1]

    b_pad = x_ref.shape[0]
    inv_b = 1.0 / float(b_real)

    # (1, b_pad) batch-mask row: zero-padded batch rows must not pollute the
    # BatchNorm statistics.  Used as the LHS of the MXU stats matmuls.
    col_ids = jax.lax.broadcasted_iota(jnp.int32, (1, b_pad), 1)
    mask_row = (col_ids < b_real).astype(jnp.float32)

    h = x_ref[...]                                 # mxu_dtype (bf16 or f32)
    for i in range(n_layers):
        w = p[2 * i][...]                          # (in_pad, out_pad) mxu_dtype
        aff = p[2 * i + 1][...]                    # (3 or 1, out_pad) f32
        b = aff[0:1, :]
        # Linear: MXU matmul with fp32 accumulation; bias add in f32.
        h = jnp.dot(h.astype(mxu_dtype), w,
                    preferred_element_type=jnp.float32) + b
        if i != n_layers - 1:
            g = aff[1:2, :]                        # BN gamma
            bt = aff[2:3, :]                       # BN beta
            # BatchNorm1d (training-mode batch stats).  Shifted single-pass
            # variance; both reductions run on the MXU (masked ones-row matmul)
            # instead of the XLU.
            shift = h[0:1, :]                      # first (always real) batch row
            hc = h - shift
            s1 = jnp.dot(mask_row, hc, preferred_element_type=jnp.float32)
            s2 = jnp.dot(mask_row, hc * hc, preferred_element_type=jnp.float32)
            mean_c = s1 * inv_b
            var = jnp.maximum(s2 * inv_b - mean_c * mean_c, 0.0)
            h = (hc - mean_c) * jax.lax.rsqrt(var + eps)
            h = h * g + bt
            # ReLU
            h = jnp.maximum(h, 0.0)
    # Final sigmoid (f32), lane-dense store (out_pad = multiple of 128).
    out_ref[...] = jax.nn.sigmoid(h).astype(out_ref.dtype)


def prepare_params(params, m, hidden_m_list, mxu_dtype=jnp.bfloat16):
    """One-time padding / packing / casting of all parameters.

    params: [W1, b1, g1, beta1, W2, b2, g2, beta2, ..., Wn, bn] with W as (in, out).
    Returns (packed_list, dims_pad) where packed_list = [W1p, aff1, ..., Wnp, affn].
    """
    n_layers = len(hidden_m_list)
    dims = [m] + list(hidden_m_list)
    dims_pad = [_round_up(d, _LANE) for d in dims]

    packed = []
    idx = 0
    for i in range(n_layers):
        k, kp = dims[i], dims_pad[i]
        n, np_ = dims[i + 1], dims_pad[i + 1]
        w, b = params[idx], params[idx + 1]
        idx += 2
        w_p = jnp.zeros((kp, np_), mxu_dtype).at[:k, :n].set(w.astype(mxu_dtype))
        if i != n_layers - 1:
            g, bt = params[idx], params[idx + 1]
            idx += 2
            aff = jnp.zeros((3, np_), jnp.float32)
            aff = aff.at[0, :n].set(b.reshape(-1))
            aff = aff.at[1, :n].set(g.reshape(-1))
            aff = aff.at[2, :n].set(bt.reshape(-1))
        else:
            aff = jnp.zeros((1, np_), jnp.float32).at[0, :n].set(b.reshape(-1))
        packed += [w_p, aff]
    return packed, dims_pad


def mlp_pallas(x, packed_params, dims_pad, hidden_m_list, eps=1e-5,
               mxu_dtype=jnp.bfloat16):
    """x: (B, m) f32.  packed_params/dims_pad from prepare_params (same mxu_dtype)."""
    n_layers = len(hidden_m_list)
    B, m = x.shape
    out_dim = hidden_m_list[-1]
    b_pad = _round_up(B, _SUBLANE)
    out_pad = dims_pad[-1]

    # Only the input is padded / cast per call; all parameter work is hoisted.
    x_p = jnp.zeros((b_pad, dims_pad[0]), mxu_dtype).at[:B, :m].set(
        x.astype(mxu_dtype))

    kernel = functools.partial(_mlp_kernel, n_layers, float(eps), B, mxu_dtype)

    def full_spec(a):
        return pl.BlockSpec(a.shape, lambda: (0,) * a.ndim)

    in_specs = [full_spec(x_p)] + [full_spec(p) for p in packed_params]
    out_specs = pl.BlockSpec((b_pad, out_pad), lambda: (0, 0))

    # Generation-aware VMEM budget: resident operands + output + live f32
    # activation slabs, capped at ~75% of this chip's physical VMEM per core.
    resident = (x_p.size * x_p.dtype.itemsize
                + sum(p.size * p.dtype.itemsize for p in packed_params)
                + b_pad * out_pad * 4
                + 4 * b_pad * max(dims_pad) * 4)
    try:
        vmem_cap = int(pltpu.get_tpu_info().vmem_capacity_bytes)
    except Exception:
        vmem_cap = 64 << 20
    vmem_limit = max(16 << 20, min(int(0.75 * vmem_cap), 4 * resident))

    out = pl.pallas_call(
        kernel,
        grid=(),
        in_specs=in_specs,
        out_specs=out_specs,
        out_shape=jax.ShapeDtypeStruct((b_pad, out_pad), jnp.float32),
        compiler_params=pltpu.CompilerParams(vmem_limit_bytes=vmem_limit),
    )(x_p, *packed_params)
    return out[:B, :out_dim]


def init_params(key, m, hidden_m_list):
    """Deterministic synthetic init (shapes match torch.nn.Linear / BatchNorm1d)."""
    params = []
    d_in = m
    n_layers = len(hidden_m_list)
    for i, d_out in enumerate(hidden_m_list):
        key, kw, kb = jax.random.split(key, 3)
        bound = 1.0 / jnp.sqrt(jnp.float32(d_in))
        # torch Linear weight is (out, in); store transposed (in, out) for x @ W.
        w = jax.random.uniform(kw, (d_in, d_out), jnp.float32, -bound, bound)
        b = jax.random.uniform(kb, (1, d_out), jnp.float32, -bound, bound)
        params += [w, b]
        if i != n_layers - 1:
            # BatchNorm1d affine defaults: weight=1, bias=0.
            params += [jnp.ones((1, d_out), jnp.float32),
                       jnp.zeros((1, d_out), jnp.float32)]
        d_in = d_out
    return params


def mlp_reference(x, params, hidden_m_list, eps=1e-5):
    """Pure-JAX reference for correctness check (two-pass variance)."""
    n_layers = len(hidden_m_list)
    h = x
    idx = 0
    for i in range(n_layers):
        w, b = params[idx], params[idx + 1]
        idx += 2
        h = h @ w + b
        if i != n_layers - 1:
            g, bt = params[idx], params[idx + 1]
            idx += 2
            mean = jnp.mean(h, axis=0, keepdims=True)
            var = jnp.mean((h - mean) ** 2, axis=0, keepdims=True)
            h = (h - mean) * jax.lax.rsqrt(var + eps)
            h = h * g + bt
            h = jnp.maximum(h, 0.0)
    return jax.nn.sigmoid(h)


if __name__ == "__main__":
    key = jax.random.PRNGKey(0)

    m = 16                       # input features
    hidden_m_list = [32, 32, 1]  # MLP(m, hidden_m_list)
    eps = 1e-5

    key, kp = jax.random.split(key)
    params = init_params(kp, m, hidden_m_list)

    # One-time parameter packing (done at model-setup time, not per forward call).
    packed_bf16, dims_pad = prepare_params(params, m, hidden_m_list, jnp.bfloat16)
    packed_f32, _ = prepare_params(params, m, hidden_m_list, jnp.float32)

    # Case 1: default bf16 MXU path (f32 accumulate / BN / sigmoid), B multiple of 8.
    key, kx = jax.random.split(key)
    x8 = jax.random.normal(kx, (8, m), jnp.float32)
    ref8 = mlp_reference(x8, params, hidden_m_list, eps)
    out8 = jax.block_until_ready(
        mlp_pallas(x8, packed_bf16, dims_pad, hidden_m_list, eps))
    assert out8.shape == (8, hidden_m_list[-1])
    assert jnp.allclose(out8, ref8, atol=3e-2, rtol=0.0), (out8, ref8)

    # Case 2: f32 MXU path, tight tolerance.
    out8_f32 = jax.block_until_ready(
        mlp_pallas(x8, packed_f32, dims_pad, hidden_m_list, eps,
                   mxu_dtype=jnp.float32))
    assert jnp.allclose(out8_f32, ref8, atol=1e-4, rtol=1e-4), (out8_f32, ref8)

    # Case 3: B not a multiple of 8 (exercises the BN batch-mask row), f32 path.
    key, kx = jax.random.split(key)
    x6 = jax.random.normal(kx, (6, m), jnp.float32)
    ref6 = mlp_reference(x6, params, hidden_m_list, eps)
    out6 = jax.block_until_ready(
        mlp_pallas(x6, packed_f32, dims_pad, hidden_m_list, eps,
                   mxu_dtype=jnp.float32))
    assert out6.shape == (6, hidden_m_list[-1])
    assert jnp.allclose(out6, ref6, atol=1e-4, rtol=1e-4), (out6, ref6)

    # Case 4: bf16 path with the BN mask exercised (B not a multiple of 8).
    out6_bf16 = jax.block_until_ready(
        mlp_pallas(x6, packed_bf16, dims_pad, hidden_m_list, eps))
    assert jnp.allclose(out6_bf16, ref6, atol=3e-2, rtol=0.0), (out6_bf16, ref6)

    print("KERNEL_OK")
</pallas_src>

<mosaic_0001>
module attributes {stable_mosaic.version = 11 : i64} {
  func.func @_mlp_kernel(%arg0: memref<8x128xbf16, #tpu.memory_space<vmem>>, %arg1: memref<128x128xbf16, #tpu.memory_space<vmem>>, %arg2: memref<3x128xf32, #tpu.memory_space<vmem>>, %arg3: memref<128x128xbf16, #tpu.memory_space<vmem>>, %arg4: memref<3x128xf32, #tpu.memory_space<vmem>>, %arg5: memref<128x128xbf16, #tpu.memory_space<vmem>>, %arg6: memref<1x128xf32, #tpu.memory_space<vmem>>, %arg7: memref<8x128xf32, #tpu.memory_space<vmem>>) attributes {dimension_semantics = [], scalar_prefetch = 0 : i64, scratch_operands = 0 : i64, tpu.core_type = #tpu.core_type<tc>} {
    %0 = tpu.iota {dimensions = array<i32: 1>} : vector<1x8xi32>
    %c8_i32 = arith.constant 8 : i32
    %1 = vector.broadcast %c8_i32 : i32 to vector<1x8xi32>
    %2 = arith.cmpi slt, %0, %1 : vector<1x8xi32>
    %3 = arith.extui %2 : vector<1x8xi1> to vector<1x8xi32>
    %4 = arith.sitofp %3 : vector<1x8xi32> to vector<1x8xf32>
    %c0 = arith.constant 0 : index
    %c0_0 = arith.constant 0 : index
    %5 = vector.load %arg0[%c0, %c0_0] : memref<8x128xbf16, #tpu.memory_space<vmem>>, vector<8x128xbf16>
    %c0_1 = arith.constant 0 : index
    %c0_2 = arith.constant 0 : index
    %6 = vector.load %arg1[%c0_1, %c0_2] : memref<128x128xbf16, #tpu.memory_space<vmem>>, vector<128x128xbf16>
    %c0_3 = arith.constant 0 : index
    %c0_4 = arith.constant 0 : index
    %7 = vector.load %arg2[%c0_3, %c0_4] : memref<3x128xf32, #tpu.memory_space<vmem>>, vector<3x128xf32>
    %8 = vector.extract_strided_slice %7 {offsets = [0, 0], sizes = [1, 128], strides = [1, 1]} : vector<3x128xf32> to vector<1x128xf32>
    %cst = arith.constant dense<0.000000e+00> : vector<8x128xf32>
    %9 = tpu.matmul %5, %6, %cst {dimension_numbers = #tpu.dot_dimension_numbers<[1], [0], [0], [1], [0, 0, 1, 1], [], []>} : vector<8x128xbf16>, vector<128x128xbf16>, vector<8x128xf32> -> vector<8x128xf32>
    %10 = vector.broadcast %8 : vector<1x128xf32> to vector<8x128xf32>
    %11 = arith.addf %9, %10 : vector<8x128xf32>
    %12 = vector.extract_strided_slice %7 {offsets = [1, 0], sizes = [1, 128], strides = [1, 1]} : vector<3x128xf32> to vector<1x128xf32>
    %13 = vector.extract_strided_slice %7 {offsets = [2, 0], sizes = [1, 128], strides = [1, 1]} : vector<3x128xf32> to vector<1x128xf32>
    %14 = vector.extract_strided_slice %11 {offsets = [0, 0], sizes = [1, 128], strides = [1, 1]} : vector<8x128xf32> to vector<1x128xf32>
    %15 = vector.broadcast %14 : vector<1x128xf32> to vector<8x128xf32>
    %16 = arith.subf %11, %15 : vector<8x128xf32>
    %cst_5 = arith.constant dense<0.000000e+00> : vector<1x128xf32>
    %17 = tpu.matmul %4, %16, %cst_5 {dimension_numbers = #tpu.dot_dimension_numbers<[1], [0], [0], [1], [0, 0, 1, 1], [], []>} : vector<1x8xf32>, vector<8x128xf32>, vector<1x128xf32> -> vector<1x128xf32>
    %18 = arith.mulf %16, %16 : vector<8x128xf32>
    %cst_6 = arith.constant dense<0.000000e+00> : vector<1x128xf32>
    %19 = tpu.matmul %4, %18, %cst_6 {dimension_numbers = #tpu.dot_dimension_numbers<[1], [0], [0], [1], [0, 0, 1, 1], [], []>} : vector<1x8xf32>, vector<8x128xf32>, vector<1x128xf32> -> vector<1x128xf32>
    %cst_7 = arith.constant 1.250000e-01 : f32
    %20 = vector.broadcast %cst_7 : f32 to vector<1x128xf32>
    %21 = arith.mulf %17, %20 : vector<1x128xf32>
    %cst_8 = arith.constant 1.250000e-01 : f32
    %22 = vector.broadcast %cst_8 : f32 to vector<1x128xf32>
    %23 = arith.mulf %19, %22 : vector<1x128xf32>
    %24 = arith.mulf %21, %21 : vector<1x128xf32>
    %25 = arith.subf %23, %24 : vector<1x128xf32>
    %cst_9 = arith.constant 0.000000e+00 : f32
    %26 = vector.broadcast %cst_9 : f32 to vector<1x128xf32>
    %27 = arith.maximumf %25, %26 : vector<1x128xf32>
    %28 = vector.broadcast %21 : vector<1x128xf32> to vector<8x128xf32>
    %29 = arith.subf %16, %28 : vector<8x128xf32>
    %cst_10 = arith.constant 9.99999974E-6 : f32
    %30 = vector.broadcast %cst_10 : f32 to vector<1x128xf32>
    %31 = arith.addf %27, %30 : vector<1x128xf32>
    %32 = math.rsqrt %31 : vector<1x128xf32>
    %33 = vector.broadcast %32 : vector<1x128xf32> to vector<8x128xf32>
    %34 = arith.mulf %29, %33 : vector<8x128xf32>
    %35 = vector.broadcast %12 : vector<1x128xf32> to vector<8x128xf32>
    %36 = arith.mulf %34, %35 : vector<8x128xf32>
    %37 = vector.broadcast %13 : vector<1x128xf32> to vector<8x128xf32>
    %38 = arith.addf %36, %37 : vector<8x128xf32>
    %cst_11 = arith.constant 0.000000e+00 : f32
    %39 = vector.broadcast %cst_11 : f32 to vector<8x128xf32>
    %40 = arith.maximumf %38, %39 : vector<8x128xf32>
    %c0_12 = arith.constant 0 : index
    %c0_13 = arith.constant 0 : index
    %41 = vector.load %arg3[%c0_12, %c0_13] : memref<128x128xbf16, #tpu.memory_space<vmem>>, vector<128x128xbf16>
    %c0_14 = arith.constant 0 : index
    %c0_15 = arith.constant 0 : index
    %42 = vector.load %arg4[%c0_14, %c0_15] : memref<3x128xf32, #tpu.memory_space<vmem>>, vector<3x128xf32>
    %43 = vector.extract_strided_slice %42 {offsets = [0, 0], sizes = [1, 128], strides = [1, 1]} : vector<3x128xf32> to vector<1x128xf32>
    %44 = arith.truncf %40 : vector<8x128xf32> to vector<8x128xbf16>
    %cst_16 = arith.constant dense<0.000000e+00> : vector<8x128xf32>
    %45 = tpu.matmul %44, %41, %cst_16 {dimension_numbers = #tpu.dot_dimension_numbers<[1], [0], [0], [1], [0, 0, 1, 1], [], []>} : vector<8x128xbf16>, vector<128x128xbf16>, vector<8x128xf32> -> vector<8x128xf32>
    %46 = vector.broadcast %43 : vector<1x128xf32> to vector<8x128xf32>
    %47 = arith.addf %45, %46 : vector<8x128xf32>
    %48 = vector.extract_strided_slice %42 {offsets = [1, 0], sizes = [1, 128], strides = [1, 1]} : vector<3x128xf32> to vector<1x128xf32>
    %49 = vector.extract_strided_slice %42 {offsets = [2, 0], sizes = [1, 128], strides = [1, 1]} : vector<3x128xf32> to vector<1x128xf32>
    %50 = vector.extract_strided_slice %47 {offsets = [0, 0], sizes = [1, 128], strides = [1, 1]} : vector<8x128xf32> to vector<1x128xf32>
    %51 = vector.broadcast %50 : vector<1x128xf32> to vector<8x128xf32>
    %52 = arith.subf %47, %51 : vector<8x128xf32>
    %cst_17 = arith.constant dense<0.000000e+00> : vector<1x128xf32>
    %53 = tpu.matmul %4, %52, %cst_17 {dimension_numbers = #tpu.dot_dimension_numbers<[1], [0], [0], [1], [0, 0, 1, 1], [], []>} : vector<1x8xf32>, vector<8x128xf32>, vector<1x128xf32> -> vector<1x128xf32>
    %54 = arith.mulf %52, %52 : vector<8x128xf32>
    %cst_18 = arith.constant dense<0.000000e+00> : vector<1x128xf32>
    %55 = tpu.matmul %4, %54, %cst_18 {dimension_numbers = #tpu.dot_dimension_numbers<[1], [0], [0], [1], [0, 0, 1, 1], [], []>} : vector<1x8xf32>, vector<8x128xf32>, vector<1x128xf32> -> vector<1x128xf32>
    %cst_19 = arith.constant 1.250000e-01 : f32
    %56 = vector.broadcast %cst_19 : f32 to vector<1x128xf32>
    %57 = arith.mulf %53, %56 : vector<1x128xf32>
    %cst_20 = arith.constant 1.250000e-01 : f32
    %58 = vector.broadcast %cst_20 : f32 to vector<1x128xf32>
    %59 = arith.mulf %55, %58 : vector<1x128xf32>
    %60 = arith.mulf %57, %57 : vector<1x128xf32>
    %61 = arith.subf %59, %60 : vector<1x128xf32>
    %cst_21 = arith.constant 0.000000e+00 : f32
    %62 = vector.broadcast %cst_21 : f32 to vector<1x128xf32>
    %63 = arith.maximumf %61, %62 : vector<1x128xf32>
    %64 = vector.broadcast %57 : vector<1x128xf32> to vector<8x128xf32>
    %65 = arith.subf %52, %64 : vector<8x128xf32>
    %cst_22 = arith.constant 9.99999974E-6 : f32
    %66 = vector.broadcast %cst_22 : f32 to vector<1x128xf32>
    %67 = arith.addf %63, %66 : vector<1x128xf32>
    %68 = math.rsqrt %67 : vector<1x128xf32>
    %69 = vector.broadcast %68 : vector<1x128xf32> to vector<8x128xf32>
    %70 = arith.mulf %65, %69 : vector<8x128xf32>
    %71 = vector.broadcast %48 : vector<1x128xf32> to vector<8x128xf32>
    %72 = arith.mulf %70, %71 : vector<8x128xf32>
    %73 = vector.broadcast %49 : vector<1x128xf32> to vector<8x128xf32>
    %74 = arith.addf %72, %73 : vector<8x128xf32>
    %cst_23 = arith.constant 0.000000e+00 : f32
    %75 = vector.broadcast %cst_23 : f32 to vector<8x128xf32>
    %76 = arith.maximumf %74, %75 : vector<8x128xf32>
    %c0_24 = arith.constant 0 : index
    %c0_25 = arith.constant 0 : index
    %77 = vector.load %arg5[%c0_24, %c0_25] : memref<128x128xbf16, #tpu.memory_space<vmem>>, vector<128x128xbf16>
    %c0_26 = arith.constant 0 : index
    %c0_27 = arith.constant 0 : index
    %78 = vector.load %arg6[%c0_26, %c0_27] : memref<1x128xf32, #tpu.memory_space<vmem>>, vector<1x128xf32>
    %79 = arith.truncf %76 : vector<8x128xf32> to vector<8x128xbf16>
    %cst_28 = arith.constant dense<0.000000e+00> : vector<8x128xf32>
    %80 = tpu.matmul %79, %77, %cst_28 {dimension_numbers = #tpu.dot_dimension_numbers<[1], [0], [0], [1], [0, 0, 1, 1], [], []>} : vector<8x128xbf16>, vector<128x128xbf16>, vector<8x128xf32> -> vector<8x128xf32>
    %81 = vector.broadcast %78 : vector<1x128xf32> to vector<8x128xf32>
    %82 = arith.addf %80, %81 : vector<8x128xf32>
    %83 = arith.negf %82 : vector<8x128xf32>
    %84 = math.exp %83 : vector<8x128xf32>
    %cst_29 = arith.constant 1.000000e+00 : f32
    %85 = vector.broadcast %cst_29 : f32 to vector<8x128xf32>
    %86 = arith.addf %85, %84 : vector<8x128xf32>
    %87 = arith.divf %85, %86 : vector<8x128xf32>
    %c0_30 = arith.constant 0 : index
    %c0_31 = arith.constant 0 : index
    %88 = vector.load %arg7[%c0_30, %c0_31] : memref<8x128xf32, #tpu.memory_space<vmem>>, vector<8x128xf32>
    tpu.vector_store %arg7[%c0_30, %c0_31], %87 {strides = array<i32>} : memref<8x128xf32, #tpu.memory_space<vmem>>, vector<8x128xf32>,
    return
  }
}

</mosaic_0001>

<bundles_post_ra>
// kernel: tpu_custom_call.1
= control target key start
LH: loop header
LB: loop body
LE: loop exit
PB: predicated region body
PF: predicated region fallthrough
CT: control target
= control target key end

     0   :  { %12 = vsyncpa [#allocation3], 0  ;;  %s958_s0 = inlined_call_operand.hbm [shape: bf16[8,128], index: 0, kind: input, shape index: {}]   ;;  %s959_s1 = inlined_call_operand.hbm [shape: bf16[128,128], index: 1, kind: input, shape index: {}]   ;;  %s960_s2 = inlined_call_operand.hbm [shape: f32[3,128], index: 2, kind: input, shape index: {}]   ;;  %s961_s3 = inlined_call_operand.hbm [shape: bf16[128,128], index: 3, kind: input, shape index: {}]   ;;  %s962_s4 = inlined_call_operand.hbm [shape: f32[3,128], index: 4, kind: input, shape index: {}]   ;;  %s963_s5 = inlined_call_operand.hbm [shape: bf16[128,128], index: 5, kind: input, shape index: {}]   ;;  %s964_s6 = inlined_call_operand.vmem [shape: f32[1,128], index: 6, kind: input, shape index: {}]   ;;  %s965_s7 = inlined_call_operand.hbm [shape: f32[8,128], index: 7, kind: output, shape index: {}]  }
   0x1   :  { %13 = vsyncpa [#allocation6], 0 }
   0x2   :  { %14 = vsyncpa [#allocation9], 0 }
   0x3   :  { %15 = vsyncpa [#allocation12], 0  ;;  %s32_s26 = sshll.u32 %s959_s1, 4  ;;  %s33_s26 = int_to_ptr.hbm [resolvable:$true] %s32_s26 }
   0x4   :  { %16 = vsyncpa [#allocation4], 0  ;;  %s865_s27 = smov [#allocation5]   ;;  %s56_s8 = sshll.u32 %s961_s3, 4  ;;  %s57_s8 = int_to_ptr.hbm [resolvable:$true] %s56_s8 }
   0x5   :  { %s34_s28 = sshll.u32 %s865_s27, 4  ;;  %s866_s9 = smov 64   ;;  %s35_s28 = int_to_ptr.vmem [resolvable:$true] %s34_s28 }
   0x6   :  { %s867_s10 = smov 4   ;;  %s868_s11 = smov [#allocation8]  }
   0x7   :  { %40 = dma.hbm_to_vmem [thread:$0]  %s33_s26, 1024, %s35_s28, [#allocation6], %s866_s9, %s866_s9, %s867_s10  }
   0x8   :  { %s58_s12 = sshll.u32 %s868_s11, 4  ;;  %s22_s14 = sshll.u32 %s958_s0, 4  ;;  %s59_s12 = int_to_ptr.vmem [resolvable:$true] %s58_s12  ;;  %s23_s14 = int_to_ptr.hbm [resolvable:$true] %s22_s14 }
   0x9   :  { %64 = dma.hbm_to_vmem [thread:$0]  %s57_s8, 1024, %s59_s12, [#allocation9], %s866_s9, %s866_s9, %s867_s10  }
   0xa   :  { %s46_s16 = sshll.u32 %s960_s2, 4  ;;  %s869_s17 = smov [#allocation2]   ;;  %s47_s16 = int_to_ptr.hbm [resolvable:$true] %s46_s16 }
   0xb   :  { %s24_s18 = sshll.u32 %s869_s17, 4  ;;  %s870_s19 = smov [#allocation7]   ;;  %s25_s18 = int_to_ptr.vmem [resolvable:$true] %s24_s18 }
   0xc   :  { %27 = dma.hbm_to_vmem [thread:$0]  %s23_s14, 64, %s25_s18, [#allocation3]  }
   0xd   :  { %s48_s20 = sshll.u32 %s870_s19, 4  ;;  %s70_s0 = sshll.u32 %s962_s4, 4  ;;  %s49_s20 = int_to_ptr.vmem [resolvable:$true] %s48_s20  ;;  %s71_s0 = int_to_ptr.hbm [resolvable:$true] %s70_s0 }
   0xe   :  { %51 = dma.hbm_to_vmem [thread:$0]  %s47_s16, 64, %s49_s20, [#allocation6]  }
   0xf   :  { %s80_s25 = sshll.u32 %s963_s5, 4  ;;  %s871_s26 = smov [#allocation10]   ;;  %s81_s25 = int_to_ptr.hbm [resolvable:$true] %s80_s25 }
  0x10   :  { %s72_s2 = sshll.u32 %s871_s26, 4  ;;  %s872_s27 = smov [#allocation11]   ;;  %s73_s2 = int_to_ptr.vmem [resolvable:$true] %s72_s2 }
  0x11   :  { %75 = dma.hbm_to_vmem [thread:$0]  %s71_s0, 64, %s73_s2, [#allocation9]  }
  0x12   :  { %s82_s28 = sshll.u32 %s872_s27, 4  ;;  %s83_s28 = int_to_ptr.vmem [resolvable:$true] %s82_s28 }
  0x13   :  { %88 = dma.hbm_to_vmem [thread:$0]  %s81_s25, 1024, %s83_s28, [#allocation12], %s866_s9, %s866_s9, %s867_s10  }
  0x14   :  { %855 = dma.done.wait [#allocation3], 64  }
  0x15   :  { %856 = vsyncadd [#allocation3], 4294967232 }
  0x16   :  { %857 = dma.done.wait [#allocation6], 1088  }
  0x17   :  { %858 = vsyncadd [#allocation6], 4294966208 }
  0x18   :  { %859 = dma.done.wait [#allocation9], 1088  }
  0x19   :  { %860 = vsyncadd [#allocation9], 4294966208 }
  0x1a   :  { %861 = dma.done.wait [#allocation12], 1024  }
  0x1b   :  { %862 = vsyncadd [#allocation12], 4294966272  ;;  %v651_v0 = vld [vmem:[#allocation5 + $0x38] sm:$0xff]  ;;  %v650_v1 = vld [vmem:[#allocation5 + $0x30] sm:$0xff]  ;;  %v115_v10 = vlaneseq  ;;  %v873_v17 = vmov 0.0   ;;  %vm202_vm1 = vcmask 64512  }
  0x1c   :  { %187 = vmatpush.bf16.msra.mxu0 %v651_v0  ;;  %v649_v2 = vld [vmem:[#allocation5 + $0x28] sm:$0xff]  ;;  %v648_v3 = vld [vmem:[#allocation5 + $0x20] sm:$0xff]  ;;  %v647_v4 = vld [vmem:[#allocation5 + $0x18] sm:$0xff]  ;;  %s874_s29 = smov [#allocation13]  }
  0x1d   :  { %v646_v5 = vld [vmem:[#allocation5 + $0x10] sm:$0xff]  ;;  %v645_v6 = vld [vmem:[#allocation5 + $0x8] sm:$0xff]  ;;  %v644_v7 = vld [vmem:[#allocation5] sm:$0xff]  ;;  %v116_v12 = vand.u32 127, %v115_v10  ;;  %s527_s30 = sshll.u32 %s874_s29, 4  ;;  %s528_s30 = int_to_ptr.vmem [resolvable:$true] %s527_s30 }
  0x1e   :  { %v120_v8 = vld [vmem:[#allocation2] sm:$0xf]  ;;  %v137_v9 = vld [vmem:[#allocation7] sm:$0x7]  ;;  %v658_v22 = vld [vmem:[#allocation8 + $0x30] sm:$0xff] }
  0x1f   :  { %v138_v11 = vperm.slane %v137_v9, 0  ;;  %vm117_vm0 = vcmp.lt.s32.totalorder %v116_v12, 8  ;;  %v659_v21 = vld [vmem:[#allocation8 + $0x38] sm:$0xff]  ;;  %v657_v23 = vld [vmem:[#allocation8 + $0x28] sm:$0xff]  ;;  %v656_v24 = vld [vmem:[#allocation8 + $0x20] sm:$0xff]  ;;  %v267_v47 = vperm.slane %v137_v9, 1 }
  0x20   :  { %188 = vmatpush.bf16.msra.mxu0 %v650_v1  ;;  %v942_v18 = vsel %vm117_vm0, 1.0, %v873_v17  ;;  %339 = vmatpush.bf16.msra.mxu3 %v659_v21  ;;  %v655_v25 = vld [vmem:[#allocation8 + $0x18] sm:$0xff]  ;;  %v654_v27 = vld [vmem:[#allocation8 + $0x10] sm:$0xff]  ;;  %v653_v28 = vld [vmem:[#allocation8 + $0x8] sm:$0xff]  ;;  %v269_v49 = vperm.slane %v137_v9, 2 }
  0x21   :  { %v652_v31 = vld [vmem:[#allocation8] sm:$0xff]  ;;  %v666_v63 = vld [vmem:[#allocation11 + $0x30] sm:$0xff]  ;;  %v665_v0 = vld [vmem:[#allocation11 + $0x28] sm:$0xff] }
  0x22   :  { %v288_v54 = vld [vmem:[#allocation10] sm:$0x7]  ;;  %v664_v1 = vld [vmem:[#allocation11 + $0x20] sm:$0xff] }
  0x23   :  { %v290_v55 = vperm.slane %v288_v54, 0  ;;  %v667_v62 = vld [vmem:[#allocation11 + $0x38] sm:$0xff] }
  0x24   :  { %189 = vmatpush.bf16.msra.mxu0 %v649_v2  ;;  %340 = vmatpush.bf16.msra.mxu3 %v658_v22  ;;  %v663_v2 = vld [vmem:[#allocation11 + $0x18] sm:$0xff] }
  0x25   :  { %489 = vmatpush.bf16.msra.mxu1 %v667_v62 }
  0x28   :  { %190 = vmatpush.bf16.msra.mxu0 %v648_v3  ;;  %341 = vmatpush.bf16.msra.mxu3 %v657_v23 }
  0x29   :  { %490 = vmatpush.bf16.msra.mxu1 %v666_v63 }
  0x2c   :  { %191 = vmatpush.bf16.msra.mxu0 %v647_v4  ;;  %342 = vmatpush.bf16.msra.mxu3 %v656_v24  ;;  %v662_v4 = vld [vmem:[#allocation11 + $0x10] sm:$0xff]  ;;  %v415_v24 = vperm.slane %v288_v54, 1 }
  0x2d   :  { %491 = vmatpush.bf16.msra.mxu1 %v665_v0 }
  0x30   :  { %192 = vmatpush.bf16.msra.mxu0 %v646_v5  ;;  %343 = vmatpush.bf16.msra.mxu3 %v655_v25  ;;  %v661_v5 = vld [vmem:[#allocation11 + $0x8] sm:$0xff] }
  0x31   :  { %492 = vmatpush.bf16.msra.mxu1 %v664_v1 }
  0x34   :  { %193 = vmatpush.bf16.msra.mxu0 %v645_v6  ;;  %344 = vmatpush.bf16.msra.mxu3 %v654_v27 }
  0x35   :  { %493 = vmatpush.bf16.msra.mxu1 %v663_v2 }
  0x38   :  { %194 = vmatpush.bf16.msra.mxu0 %v644_v7  ;;  %345 = vmatpush.bf16.msra.mxu3 %v653_v28 }
  0x39   :  { %494 = vmatpush.bf16.msra.mxu1 %v662_v4 }
  0x3b   :  { %195 = vmatmul.bf16.vlgmr.msra.gmra.mxu0 %v120_v8  ;;  %v660_v8 = vld [vmem:[#allocation11] sm:$0xff] }
  0x3c   :  { %346 = vmatpush.bf16.msra.mxu3 %v652_v31  ;;  %v678_v31 = vld [vmem:[%s964_s6] ss:$0 sm:$0xff]  ;;  %s529_s6 = sshll.u32 %s965_s7, 4  ;;  %s530_s6 = int_to_ptr.hbm [resolvable:$true] %s529_s6 }
  0x3d   :  { %495 = vmatpush.bf16.msra.mxu1 %v661_v5 }
  0x41   :  { %496 = vmatpush.bf16.msra.mxu1 %v660_v8 }
  0xb8   :  { %v196_v13 = vpop.f32.mrf.mxu0 }
  0xb9   :  { %v197_v14 = vadd.f32 %v196_v13, %v138_v11 }
  0xbb   :  { %v200_v15 = vperm.slane %v197_v14, 0 }
  0xbd   :  { %v201_v16 = vsub.f32 %v197_v14, %v200_v15 }
  0xbf   :  { %221 = vmatpush.msra.mxu2 %v201_v16  ;;  %v226_v19 = vmul.f32 %v201_v16, %v201_v16 }
  0xc0   :  { %v198_v20 = vpop.f32.mrf.mxu0  ;;  %575 = vmatmul.msk.f32.vlgmr.msra.gmra.mxu2 %vm202_vm1, %v942_v18 }
  0xc1   :  { %242 = vmatpush.msrb.mxu2 %v226_v19 }
  0xc8   :  { %576 = vmatmul.msk.f32.vlgmr.msrb.gmra.mxu2 %vm202_vm1, %v942_v18 }
 0x143   :  { %v223_v26 = vpop.f32.mrf.mxu2 }
 0x144   :  { %v247_v29 = vmul.f32 0.125, %v223_v26  ;;  %v417_v26 = vperm.slane %v288_v54, 2 }
 0x146   :  { %v249_v32 = vmul.f32 %v247_v29, %v247_v29  ;;  %v252_v42 = vperm.slane %v247_v29, 0 }
 0x148   :  { %v253_v45 = vsub.f32 %v201_v16, %v252_v42 }
 0x14b   :  { %v244_v30 = vpop.f32.mrf.mxu2 }
 0x14c   :  { %v248_v33 = vmul.f32 0.125, %v244_v30 }
 0x14e   :  { %v250_v34 = vsub.f32 %v248_v33, %v249_v32 }
 0x150   :  { %v251_v35 = vmax.f32 %v250_v34, 0.0 }
 0x152   :  { %v254_v36 = vadd.f32 1e-05, %v251_v35 }
 0x154   :  { %679 = vrsqrt.f32 %v254_v36  ;;  %vm261_vm3 = vweird.f32 %v254_v36 }
 0x15a   :  { %v680_v37 = vpop.eup %679 }
 0x15b   :  { %v256_v38 = vmul.f32 %v680_v37, %v254_v36  ;;  %vm262_vm2 = vweird.f32 %v680_v37 }
 0x15c   :  { %vm263_vm4 = vmor %vm261_vm3, %vm262_vm2 }
 0x15d   :  { %v257_v39 = vmul.f32 %v680_v37, %v256_v38 }
 0x15f   :  { %v258_v40 = vmul.f32 0.5, %v257_v39 }
 0x161   :  { %v259_v41 = vsub.f32 1.5, %v258_v40 }
 0x163   :  { %v260_v43 = vmul.f32 %v680_v37, %v259_v41 }
 0x165   :  { %v264_v44 = vsel %vm263_vm4, %v680_v37, %v260_v43 }
 0x166   :  { %v265_v46 = vperm.slane %v264_v44, 0 }
 0x168   :  { %v266_v48 = vmul.f32 %v265_v46, %v253_v45 }
 0x16a   :  { %v268_v50 = vmul.f32 %v267_v47, %v266_v48 }
 0x16c   :  { %v270_v51 = vadd.f32 %v269_v49, %v268_v50 }
 0x16e   :  { %v271_v52 = vmax.f32 %v270_v51, 0.0 }
 0x170   :  { %v289_v53 = vpack.c.bf16 %v271_v52, %v271_v52 }
 0x172   :  { %347 = vmatmul.bf16.vlgmr.msra.gmra.mxu3 %v289_v53 }
 0x1f5   :  { %v348_v56 = vpop.f32.mrf.mxu3 }
 0x1f6   :  { %v349_v57 = vadd.f32 %v348_v56, %v290_v55 }
 0x1f8   :  { %v352_v58 = vperm.slane %v349_v57, 0 }
 0x1fa   :  { %v353_v59 = vsub.f32 %v349_v57, %v352_v58 }
 0x1fc   :  { %v374_v60 = vmul.f32 %v353_v59, %v353_v59  ;;  %369 = vmatpush.msra.mxu2 %v353_v59 }
 0x1fd   :  { %v350_v61 = vpop.f32.mrf.mxu3  ;;  %609 = vmatmul.msk.f32.vlgmr.msra.gmra.mxu2 %vm202_vm1, %v942_v18 }
 0x1fe   :  { %390 = vmatpush.msrb.mxu2 %v374_v60 }
 0x205   :  { %610 = vmatmul.msk.f32.vlgmr.msrb.gmra.mxu2 %vm202_vm1, %v942_v18 }
 0x280   :  { %v371_v3 = vpop.f32.mrf.mxu2 }
 0x281   :  { %v395_v6 = vmul.f32 0.125, %v371_v3 }
 0x283   :  { %v397_v9 = vmul.f32 %v395_v6, %v395_v6  ;;  %v400_v19 = vperm.slane %v395_v6, 0 }
 0x285   :  { %v401_v22 = vsub.f32 %v353_v59, %v400_v19 }
 0x288   :  { %v392_v7 = vpop.f32.mrf.mxu2 }
 0x289   :  { %v396_v10 = vmul.f32 0.125, %v392_v7 }
 0x28b   :  { %v398_v11 = vsub.f32 %v396_v10, %v397_v9 }
 0x28d   :  { %v399_v12 = vmax.f32 %v398_v11, 0.0 }
 0x28f   :  { %v402_v13 = vadd.f32 1e-05, %v399_v12 }
 0x291   :  { %681 = vrsqrt.f32 %v402_v13  ;;  %vm409_vm6 = vweird.f32 %v402_v13 }
 0x297   :  { %v682_v14 = vpop.eup %681 }
 0x298   :  { %v404_v15 = vmul.f32 %v682_v14, %v402_v13  ;;  %vm410_vm5 = vweird.f32 %v682_v14 }
 0x299   :  { %vm411_vm7 = vmor %vm409_vm6, %vm410_vm5 }
 0x29a   :  { %v405_v16 = vmul.f32 %v682_v14, %v404_v15 }
 0x29c   :  { %v406_v17 = vmul.f32 0.5, %v405_v16 }
 0x29e   :  { %v407_v18 = vsub.f32 1.5, %v406_v17 }
 0x2a0   :  { %v408_v20 = vmul.f32 %v682_v14, %v407_v18 }
 0x2a2   :  { %v412_v21 = vsel %vm411_vm7, %v682_v14, %v408_v20 }
 0x2a3   :  { %v413_v23 = vperm.slane %v412_v21, 0 }
 0x2a5   :  { %v414_v25 = vmul.f32 %v413_v23, %v401_v22 }
 0x2a7   :  { %v416_v27 = vmul.f32 %v415_v24, %v414_v25 }
 0x2a9   :  { %v418_v28 = vadd.f32 %v417_v26, %v416_v27 }
 0x2ab   :  { %v419_v29 = vmax.f32 %v418_v28, 0.0 }
 0x2ad   :  { %v437_v30 = vpack.c.bf16 %v419_v29, %v419_v29 }
 0x2af   :  { %497 = vmatmul.bf16.vlgmr.msra.gmra.mxu1 %v437_v30 }
 0x32c   :  { %v498_v32 = vpop.f32.mrf.mxu1 }
 0x32d   :  { %v499_v33 = vadd.f32 %v678_v31, %v498_v32 }
 0x32f   :  { %v643_v34 = vmul.f32 -1.442695, %v499_v33 }
 0x331   :  { %683 = vpow2.f32 %v643_v34 }
 0x334   :  { %v500_v35 = vpop.f32.mrf.mxu1 }
 0x337   :  { %v684_v36 = vpop.eup %683 }
 0x338   :  { %v505_v37 = vadd.f32 1.0, %v684_v36 }
 0x33a   :  { %685 = vrcp.f32 %v505_v37  ;;  %v517_v41 = vand.u32 2147483648, %v505_v37  ;;  %v515_v43 = vand.u32 2147483647, %v505_v37  ;;  %vm511_vm9 = vweird.f32 %v505_v37 }
 0x33c   :  { %v518_v45 = vor.u32 1.1754944e-38, %v517_v41  ;;  %vm516_vm11 = vcmp.eq.f32.partialorder %v515_v43, 8.507059e+37 }
 0x340   :  { %v686_v38 = vpop.eup %685 }
 0x341   :  { %v507_v39 = vmul.f32 %v686_v38, %v505_v37  ;;  %vm512_vm8 = vweird.f32 %v686_v38 }
 0x342   :  { %vm513_vm10 = vmor %vm511_vm9, %vm512_vm8 }
 0x343   :  { %v508_v40 = vsub.f32 1.0, %v507_v39 }
 0x345   :  { %v509_v42 = vmul.f32 %v686_v38, %v508_v40 }
 0x347   :  { %v510_v44 = vadd.f32 %v686_v38, %v509_v42 }
 0x349   :  { %v514_v46 = vsel %vm513_vm10, %v686_v38, %v510_v44 }
 0x34a   :  { %v519_v47 = vsel %vm516_vm11, %v518_v45, %v514_v46 }
 0x34b   :  { %521 = vst [vmem:[#allocation13] sm:$0xff] %v519_v47 }
 0x34c   :  { %532 = dma.vmem_to_hbm [thread:$0]  %s528_s30, 128, %s530_s6, [#allocation4]  }
 0x34d   :  { %863 = dma.done.wait [#allocation4], 128  }
 0x34e   :  { %864 = vsyncadd [#allocation4], 4294967168 }
 0x34f   :  { %537 = vsyncpa [#allocation3], 1 }
 0x350   :  { %538 = vsyncpa [#allocation6], 1 }
 0x351   :  { %539 = vsyncpa [#allocation9], 1 }
 0x352   :  { %540 = vsyncpa [#allocation12], 1 }
 0x353   :  { %541 = vsyncpa [#allocation4], 1 }

</bundles_post_ra>
